<compile_context>
chip_gen: v6e
topology: v6e:2x2x1
jax: 0.10.0
libtpu: 0.0.40
codegen_flags: <defaults>
</compile_context>

<pallas_src>
import functools

import jax
import jax.numpy as jnp
from jax.experimental import pallas as pl
from jax.experimental.pallas import tpu as pltpu


def _layernorm(x, eps):
    mu = jnp.mean(x, axis=-1, keepdims=True)
    xc = x - mu
    var = jnp.mean(xc * xc, axis=-1, keepdims=True)
    return xc * jax.lax.rsqrt(var + eps)


# --------------------------------------------------------------------------------------
# call 1: adaLN(MSA) + LayerNorm + fused QKV projection (single matmul, bf16 on the MXU)
# --------------------------------------------------------------------------------------
def _qkv_kernel(eps, x_ref, comb_ref, w_ref, b_ref, o_ref):
    x = x_ref[0].astype(jnp.float32)                                 # (TS, D)
    comb = comb_ref[0]                                               # (6, D) f32
    shift_msa = comb[0:1, :]
    scale_msa = comb[1:2, :]

    n1 = _layernorm(x, eps) * (1.0 + scale_msa) + shift_msa
    qkv = jnp.dot(n1.astype(jnp.bfloat16), w_ref[...],
                  preferred_element_type=jnp.float32) + b_ref[...]   # (TS, 3*inner)
    o_ref[0] = qkv.astype(o_ref.dtype)


# --------------------------------------------------------------------------------------
# call 2: head-grouped RoPE + softmax attention, lane-dense (Hg*head_dim) blocks
# --------------------------------------------------------------------------------------
def _attn_kernel(num_group_heads, head_dim,
                 q_ref, k_ref, v_ref, cq_ref, sq_ref, ck_ref, sk_ref, o_ref):
    half = head_dim // 2
    q = q_ref[0]                                                     # (tq, Hg*hd) bf16
    k = k_ref[0]                                                     # (S , Hg*hd) bf16
    v = v_ref[0]                                                     # (S , Hg*hd) bf16
    cq = cq_ref[...]                                                 # (tq, hd) f32
    sq = sq_ref[...]                                                 # sign-folded sin (q rows)
    ck = ck_ref[...]                                                 # (S, hd) f32
    sk = sk_ref[...]

    outs = []
    for h in range(num_group_heads):                                 # static, unrolled
        sl = slice(h * head_dim, (h + 1) * head_dim)
        qh = q[:, sl].astype(jnp.float32)
        kh = k[:, sl].astype(jnp.float32)
        # rotate_half == roll by hd//2 within a head (symmetric, direction-independent),
        # with the sign pattern folded into the precomputed sin.
        qh = qh * cq + pltpu.roll(qh, half, 1) * sq
        kh = kh * ck + pltpu.roll(kh, half, 1) * sk

        s = jax.lax.dot_general(qh.astype(jnp.bfloat16), kh.astype(jnp.bfloat16),
                                (((1,), (1,)), ((), ())),
                                preferred_element_type=jnp.float32)  # (tq, S)
        s = s - jnp.max(s, axis=-1, keepdims=True)
        p = jnp.exp(s)
        p = p * pl.reciprocal(jnp.sum(p, axis=-1, keepdims=True), approx=True)
        outs.append(jnp.dot(p.astype(jnp.bfloat16), v[:, sl],
                            preferred_element_type=jnp.float32))     # (tq, hd)

    o_ref[0] = jnp.concatenate(outs, axis=-1).astype(o_ref.dtype)    # single 128-lane store


# --------------------------------------------------------------------------------------
# call 3: out-proj + gated MSA residual + adaLN(MLP) + streamed SiLU MLP + gated residual
# --------------------------------------------------------------------------------------
def _ffn_kernel(eps,
                x_ref, attn_ref, comb_ref, wo_ref, bo_ref, wg_ref, wu_ref, wd_ref,
                o_ref, xnew_scr, n2_scr, gmlp_scr, acc_scr):
    i = pl.program_id(2)

    @pl.when(i == 0)
    def _():
        x = x_ref[0].astype(jnp.float32)                             # (TS, D)
        comb = comb_ref[0]                                           # (6, D) f32
        gate_msa = comb[2:3, :]
        shift_mlp = comb[3:4, :]
        scale_mlp = comb[4:5, :]
        gmlp_scr[...] = comb[5:6, :]                                 # stash gate_mlp

        attn_o = jnp.dot(attn_ref[0], wo_ref[...],
                         preferred_element_type=jnp.float32) + bo_ref[...]
        x_new = x + gate_msa * attn_o
        xnew_scr[...] = x_new

        n2 = _layernorm(x_new, eps) * (1.0 + scale_mlp) + shift_mlp
        n2_scr[...] = n2.astype(jnp.bfloat16)
        acc_scr[...] = jnp.zeros_like(acc_scr)

    n2b = n2_scr[...]
    g = jnp.dot(n2b, wg_ref[...], preferred_element_type=jnp.float32)
    u = jnp.dot(n2b, wu_ref[...], preferred_element_type=jnp.float32)
    h = (g * jax.nn.sigmoid(g)) * u                                  # SiLU(gate) * up
    acc_scr[...] += jnp.dot(h.astype(jnp.bfloat16), wd_ref[...],
                            preferred_element_type=jnp.float32)

    @pl.when(i == pl.num_programs(2) - 1)
    def _():
        o_ref[0] = (xnew_scr[...] + gmlp_scr[...] * acc_scr[...]).astype(o_ref.dtype)


# --------------------------------------------------------------------------------------
# wrapper
# --------------------------------------------------------------------------------------
def _vmem_limit_bytes():
    # 3/4 of physical VMEM (leaves headroom for compiler scratch); conservative fallback.
    try:
        cap = int(getattr(pltpu.get_tpu_info(), "vmem_capacity_bytes", 0))
        if cap > 0:
            return (cap * 3) // 4
    except Exception:
        pass
    return 48 * 1024 * 1024


def _pick_tile(total, cap, quantum):
    """Largest divisor of `total` that is <= cap and a multiple of `quantum`, else `total`."""
    if total <= cap:
        return total
    t = (cap // quantum) * quantum
    while t >= quantum:
        if total % t == 0:
            return t
        t -= quantum
    return total


def sana_block(hidden, timestep, cos, sin, params, *, num_heads, head_dim,
               eps=1e-6, seq_tile=None, q_tile=None, mlp_i_tile=None):
    B, S, D = hidden.shape
    H = num_heads
    inner = H * head_dim
    I = params["wg"].shape[1]
    half = head_dim // 2
    bf, f32 = jnp.bfloat16, jnp.float32
    scale = 1.0 / (head_dim ** 0.5)

    # adaLN modulation table, computed once in the wrapper:  comb = sst[None] + timestep
    comb = params["sst"][None].astype(f32) + timestep.reshape(B, 6, D).astype(f32)

    # fused QKV weight/bias; softmax scale folded into the q columns.  bf16 weights on the MXU.
    wqkv = jnp.concatenate([params["wq"] * scale, params["wk"], params["wv"]], axis=1).astype(bf)
    bqkv = jnp.concatenate([params["bq"] * scale, params["bk"], params["bv"]], axis=1).astype(f32)
    wo, wg, wu, wd = (params[n].astype(bf) for n in ("wo", "wg", "wu", "wd"))
    bo = params["bo"].astype(f32)

    cosf = cos.astype(f32)                                            # (S, hd)
    # fold the rotate_half sign pattern into sin -> one symmetric lane roll per tensor in-kernel
    sins = jnp.concatenate([-sin[:, :half], sin[:, half:]], axis=-1).astype(f32)

    # ---- tiling ----
    ts_t = seq_tile if seq_tile is not None else _pick_tile(S, 256, 8)
    assert S % ts_t == 0 and (ts_t == S or ts_t % 8 == 0)
    n_st = S // ts_t

    tq = q_tile if q_tile is not None else _pick_tile(S, 256, 8)
    assert S % tq == 0 and (tq == S or tq % 8 == 0)
    n_q = S // tq

    i_t = mlp_i_tile if mlp_i_tile is not None else _pick_tile(I, 512, 128)
    assert I % i_t == 0 and (i_t == I or i_t % 128 == 0)
    n_i = I // i_t

    # head grouping: Hg heads per attention grid step with Hg*head_dim a multiple of 128 lanes
    Hg = 0
    for cand in range(min(H, max(1, 128 // head_dim)), 0, -1):
        if H % cand == 0 and (cand * head_dim) % 128 == 0:
            Hg = cand
            break
    assert Hg > 0, ("need a divisor g of num_heads with g*head_dim % 128 == 0; "
                    "pad heads for this config")
    G = H // Hg
    ghd = Hg * head_dim

    vmem_limit = _vmem_limit_bytes()

    def cparams(sem):
        return pltpu.CompilerParams(dimension_semantics=sem, vmem_limit_bytes=vmem_limit)

    # ---- call 1: adaLN(MSA) + LN + fused QKV projection ----
    qkv = pl.pallas_call(
        functools.partial(_qkv_kernel, eps),
        out_shape=jax.ShapeDtypeStruct((B, S, 3 * inner), bf),
        grid_spec=pltpu.PrefetchScalarGridSpec(
            num_scalar_prefetch=0,
            grid=(B, n_st),
            in_specs=[
                pl.BlockSpec((1, ts_t, D), lambda b, s: (b, s, 0)),          # hidden
                pl.BlockSpec((1, 6, D), lambda b, s: (b, 0, 0)),             # comb
                pl.BlockSpec((D, 3 * inner), lambda b, s: (0, 0)),           # fused wqkv
                pl.BlockSpec((1, 3 * inner), lambda b, s: (0, 0)),           # fused bqkv
            ],
            out_specs=pl.BlockSpec((1, ts_t, 3 * inner), lambda b, s: (b, s, 0)),
        ),
        compiler_params=cparams(("parallel", "parallel")),
        cost_estimate=pl.CostEstimate(
            flops=int(6 * B * S * D * inner),
            transcendentals=int(B * S),
            bytes_accessed=int(2 * D * 3 * inner + 4 * B * S * D + 2 * B * S * 3 * inner)),
    )(hidden, comb, wqkv, bqkv)

    # ---- call 2: head-grouped RoPE + attention, reads/writes the flat (B, S, *) layout ----
    attn = pl.pallas_call(
        functools.partial(_attn_kernel, Hg, head_dim),
        out_shape=jax.ShapeDtypeStruct((B, S, inner), bf),
        grid_spec=pltpu.PrefetchScalarGridSpec(
            num_scalar_prefetch=0,
            grid=(B, G, n_q),
            in_specs=[
                pl.BlockSpec((1, tq, ghd), lambda b, g, qi: (b, qi, g)),          # q window
                pl.BlockSpec((1, S, ghd), lambda b, g, qi: (b, 0, G + g)),        # k window
                pl.BlockSpec((1, S, ghd), lambda b, g, qi: (b, 0, 2 * G + g)),    # v window
                pl.BlockSpec((tq, head_dim), lambda b, g, qi: (qi, 0)),           # cos (q rows)
                pl.BlockSpec((tq, head_dim), lambda b, g, qi: (qi, 0)),           # signed sin
                pl.BlockSpec((S, head_dim), lambda b, g, qi: (0, 0)),             # cos (k rows)
                pl.BlockSpec((S, head_dim), lambda b, g, qi: (0, 0)),             # signed sin
            ],
            out_specs=pl.BlockSpec((1, tq, ghd), lambda b, g, qi: (b, qi, g)),
        ),
        compiler_params=cparams(("parallel", "parallel", "parallel")),
        cost_estimate=pl.CostEstimate(
            flops=int(4 * B * S * S * inner),
            transcendentals=int(B * H * S * S),
            bytes_accessed=int(2 * 4 * B * S * inner + 4 * 4 * S * head_dim)),
    )(qkv, qkv, qkv, cosf, sins, cosf, sins)

    # ---- call 3: out-proj + gated residual + streamed SiLU MLP ----
    out = pl.pallas_call(
        functools.partial(_ffn_kernel, eps),
        out_shape=jax.ShapeDtypeStruct((B, S, D), hidden.dtype),
        grid_spec=pltpu.PrefetchScalarGridSpec(
            num_scalar_prefetch=0,
            grid=(B, n_st, n_i),
            in_specs=[
                pl.BlockSpec((1, ts_t, D), lambda b, s, i: (b, s, 0)),        # residual x
                pl.BlockSpec((1, ts_t, inner), lambda b, s, i: (b, s, 0)),    # attention output
                pl.BlockSpec((1, 6, D), lambda b, s, i: (b, 0, 0)),           # comb
                pl.BlockSpec((inner, D), lambda b, s, i: (0, 0)),             # wo
                pl.BlockSpec((1, D), lambda b, s, i: (0, 0)),                 # bo
                pl.BlockSpec((D, i_t), lambda b, s, i: (0, i)),               # gate_proj (streamed)
                pl.BlockSpec((D, i_t), lambda b, s, i: (0, i)),               # up_proj   (streamed)
                pl.BlockSpec((i_t, D), lambda b, s, i: (i, 0)),               # down_proj (streamed)
            ],
            out_specs=pl.BlockSpec((1, ts_t, D), lambda b, s, i: (b, s, 0)),
            scratch_shapes=[
                pltpu.VMEM((ts_t, D), jnp.float32),    # x after attention residual
                pltpu.VMEM((ts_t, D), jnp.bfloat16),   # modulated LayerNorm input to the MLP
                pltpu.VMEM((1, D), jnp.float32),       # gate_mlp stash
                pltpu.VMEM((ts_t, D), jnp.float32),    # down_proj accumulator
            ],
        ),
        compiler_params=cparams(("parallel", "parallel", "arbitrary")),
        cost_estimate=pl.CostEstimate(
            flops=int(B * S * (2 * inner * D + 6 * D * I)),
            transcendentals=int(B * S * I),
            bytes_accessed=int(2 * (inner * D + 3 * D * I) + 4 * B * S * 2 * D + 2 * B * S * inner)),
    )(hidden, attn, comb, wo, bo, wg, wu, wd)
    return out


# --------------------------------------------------------------------------------------
# pure-JAX reference (mirrors the kernel's bf16 rounding points on the MXU path)
# --------------------------------------------------------------------------------------
def reference(hidden, timestep, cos, sin, p, *, num_heads, head_dim, eps=1e-6):
    B, S, D = hidden.shape
    H, hd = num_heads, head_dim
    f32, bf16 = jnp.float32, jnp.bfloat16

    def mm(a, b):
        return jnp.matmul(a.astype(bf16), b.astype(bf16), preferred_element_type=f32)

    def ln(y):
        mu = jnp.mean(y, axis=-1, keepdims=True)
        var = jnp.mean((y - mu) ** 2, axis=-1, keepdims=True)
        return (y - mu) * jax.lax.rsqrt(var + eps)

    x = hidden.astype(f32)
    comb = p["sst"][None].astype(f32) + timestep.reshape(B, 6, D).astype(f32)
    sh_msa, sc_msa, g_msa, sh_mlp, sc_mlp, g_mlp = [comb[:, i:i + 1] for i in range(6)]

    n1 = ln(x) * (1 + sc_msa) + sh_msa
    q = (mm(n1, p["wq"]) + p["bq"]) * (1.0 / hd ** 0.5)
    k = mm(n1, p["wk"]) + p["bk"]
    v = mm(n1, p["wv"]) + p["bv"]
    # the kernel stores fused q/k/v in bf16 between the projection and attention calls
    q, k, v = (t.astype(bf16).astype(f32) for t in (q, k, v))

    def split(t):
        return t.reshape(B, S, H, hd).transpose(0, 2, 1, 3)

    q, k, v = split(q), split(k), split(v)
    c = cos[None, None].astype(f32)
    s = sin[None, None].astype(f32)

    def rot(t):
        h2 = t.shape[-1] // 2
        return jnp.concatenate([-t[..., h2:], t[..., :h2]], axis=-1)

    q = q * c + rot(q) * s
    k = k * c + rot(k) * s

    scores = jnp.einsum("bhqd,bhkd->bhqk", q.astype(bf16), k.astype(bf16),
                        preferred_element_type=f32)
    att = jax.nn.softmax(scores, axis=-1)
    o = jnp.einsum("bhqk,bhkd->bhqd", att.astype(bf16), v.astype(bf16),
                   preferred_element_type=f32)
    o = o.astype(bf16).astype(f32)               # kernel stores attention outputs in bf16
    o = o.transpose(0, 2, 1, 3).reshape(B, S, H * hd)
    o = mm(o, p["wo"]) + p["bo"]
    x = x + g_msa * o

    n2 = ln(x) * (1 + sc_mlp) + sh_mlp
    g = mm(n2, p["wg"])
    u = mm(n2, p["wu"])
    ff = mm(jax.nn.silu(g) * u, p["wd"])
    return x + g_mlp * ff


if __name__ == "__main__":
    B, S, D = 2, 16, 256
    num_heads, head_dim = 8, 32                 # attention_head_dim = 32 (as in Sana)
    inner = num_heads * head_dim                # 256
    I = int(D * 2.5)                            # mlp_ratio = 2.5 -> 640

    key = jax.random.PRNGKey(0)
    ks = jax.random.split(key, 16)
    sc = 0.05
    params = {
        "sst": jax.random.normal(ks[0], (6, D), jnp.float32) / (D ** 0.5),
        "wq": jax.random.normal(ks[1], (D, inner), jnp.float32) * sc,
        "bq": jax.random.normal(ks[2], (1, inner), jnp.float32) * sc,
        "wk": jax.random.normal(ks[3], (D, inner), jnp.float32) * sc,
        "bk": jax.random.normal(ks[4], (1, inner), jnp.float32) * sc,
        "wv": jax.random.normal(ks[5], (D, inner), jnp.float32) * sc,
        "bv": jax.random.normal(ks[6], (1, inner), jnp.float32) * sc,
        "wo": jax.random.normal(ks[7], (inner, D), jnp.float32) * sc,
        "bo": jax.random.normal(ks[8], (1, D), jnp.float32) * sc,
        "wg": jax.random.normal(ks[9], (D, I), jnp.float32) * sc,
        "wu": jax.random.normal(ks[10], (D, I), jnp.float32) * sc,
        "wd": jax.random.normal(ks[11], (I, D), jnp.float32) * sc,
    }
    hidden = jax.random.normal(ks[12], (B, S, D), jnp.float32)
    timestep = jax.random.normal(ks[13], (B, 6 * D), jnp.float32) * 0.1

    # rotary position embeddings, shared across batch: (S, head_dim)
    pos = jnp.arange(S, dtype=jnp.float32)
    inv_freq = 1.0 / (10000.0 ** (jnp.arange(0, head_dim, 2, dtype=jnp.float32) / head_dim))
    ang = pos[:, None] * inv_freq[None, :]
    emb = jnp.concatenate([ang, ang], axis=-1)
    cos = jnp.cos(emb)
    sin = jnp.sin(emb)

    # small tiles chosen to exercise the multi-step grid paths (seq/q tiling + MLP streaming)
    out = sana_block(hidden, timestep, cos, sin, params,
                     num_heads=num_heads, head_dim=head_dim, eps=1e-6,
                     seq_tile=8, q_tile=8, mlp_i_tile=128)
    out = jax.block_until_ready(out)

    ref = reference(hidden, timestep, cos, sin, params,
                    num_heads=num_heads, head_dim=head_dim, eps=1e-6)
    assert out.shape == (B, S, D)
    max_err = float(jnp.max(jnp.abs(out - ref)))
    assert jnp.allclose(out, ref, rtol=2e-2, atol=2e-2), \
        f"mismatch vs reference (max abs err {max_err})"
    print("KERNEL_OK")
</pallas_src>

<mosaic_0001>
module attributes {stable_mosaic.version = 11 : i64} {
  func.func @_qkv_kernel(%arg0: i32, %arg1: i32, %arg2: memref<1x8x256xf32, #tpu.memory_space<vmem>>, %arg3: memref<1x6x256xf32, #tpu.memory_space<vmem>>, %arg4: memref<256x768xbf16, #tpu.memory_space<vmem>>, %arg5: memref<1x768xf32, #tpu.memory_space<vmem>>, %arg6: memref<1x8x768xbf16, #tpu.memory_space<vmem>>) attributes {dimension_semantics = [#tpu.dimension_semantics<parallel>, #tpu.dimension_semantics<parallel>], iteration_bounds = array<i64: 2, 2>, scalar_prefetch = 0 : i64, scratch_operands = 0 : i64, tpu.core_type = #tpu.core_type<tc>, window_params = [{transform_indices = @transform_0, window_bounds = array<i64: 1, 8, 256>}, {transform_indices = @transform_1, window_bounds = array<i64: 1, 6, 256>}, {pipeline_mode = #tpu.pipeline_mode<synchronous>, transform_indices = @transform_2, window_bounds = array<i64: 256, 768>}, {pipeline_mode = #tpu.pipeline_mode<synchronous>, transform_indices = @transform_3, window_bounds = array<i64: 1, 768>}, {transform_indices = @transform_4, window_bounds = array<i64: 1, 8, 768>}]} {
    %c0 = arith.constant 0 : index
    %c0_0 = arith.constant 0 : index
    %c0_1 = arith.constant 0 : index
    %0 = vector.load %arg2[%c0, %c0_0, %c0_1] : memref<1x8x256xf32, #tpu.memory_space<vmem>>, vector<1x8x256xf32>
    %1 = vector.shape_cast %0 : vector<1x8x256xf32> to vector<8x256xf32>
    %c0_2 = arith.constant 0 : index
    %c0_3 = arith.constant 0 : index
    %c0_4 = arith.constant 0 : index
    %2 = vector.load %arg3[%c0_2, %c0_3, %c0_4] : memref<1x6x256xf32, #tpu.memory_space<vmem>>, vector<1x6x256xf32>
    %3 = vector.shape_cast %2 : vector<1x6x256xf32> to vector<6x256xf32>
    %4 = vector.extract_strided_slice %3 {offsets = [0, 0], sizes = [1, 256], strides = [1, 1]} : vector<6x256xf32> to vector<1x256xf32>
    %5 = vector.extract_strided_slice %3 {offsets = [1, 0], sizes = [1, 256], strides = [1, 1]} : vector<6x256xf32> to vector<1x256xf32>
    %cst = arith.constant dense<0.000000e+00> : vector<8xf32>
    %6 = vector.multi_reduction <add>, %1, %cst [1] : vector<8x256xf32> to vector<8xf32>
    %7 = vector.shape_cast %6 : vector<8xf32> to vector<8x1xf32>
    %cst_5 = arith.constant 2.560000e+02 : f32
    %8 = vector.broadcast %cst_5 : f32 to vector<8x1xf32>
    %9 = arith.divf %7, %8 : vector<8x1xf32>
    %10 = vector.broadcast %9 : vector<8x1xf32> to vector<8x256xf32>
    %11 = arith.subf %1, %10 : vector<8x256xf32>
    %12 = arith.mulf %11, %11 : vector<8x256xf32>
    %cst_6 = arith.constant dense<0.000000e+00> : vector<8xf32>
    %13 = vector.multi_reduction <add>, %12, %cst_6 [1] : vector<8x256xf32> to vector<8xf32>
    %14 = vector.shape_cast %13 : vector<8xf32> to vector<8x1xf32>
    %cst_7 = arith.constant 2.560000e+02 : f32
    %15 = vector.broadcast %cst_7 : f32 to vector<8x1xf32>
    %16 = arith.divf %14, %15 : vector<8x1xf32>
    %cst_8 = arith.constant 9.99999997E-7 : f32
    %17 = vector.broadcast %cst_8 : f32 to vector<8x1xf32>
    %18 = arith.addf %16, %17 : vector<8x1xf32>
    %19 = math.rsqrt %18 : vector<8x1xf32>
    %20 = vector.broadcast %19 : vector<8x1xf32> to vector<8x256xf32>
    %21 = arith.mulf %11, %20 : vector<8x256xf32>
    %cst_9 = arith.constant 1.000000e+00 : f32
    %22 = vector.broadcast %cst_9 : f32 to vector<1x256xf32>
    %23 = arith.addf %22, %5 : vector<1x256xf32>
    %24 = vector.broadcast %23 : vector<1x256xf32> to vector<8x256xf32>
    %25 = arith.mulf %21, %24 : vector<8x256xf32>
    %26 = vector.broadcast %4 : vector<1x256xf32> to vector<8x256xf32>
    %27 = arith.addf %25, %26 : vector<8x256xf32>
    %28 = arith.truncf %27 : vector<8x256xf32> to vector<8x256xbf16>
    %c0_10 = arith.constant 0 : index
    %c0_11 = arith.constant 0 : index
    %29 = vector.load %arg4[%c0_10, %c0_11] : memref<256x768xbf16, #tpu.memory_space<vmem>>, vector<256x768xbf16>
    %cst_12 = arith.constant dense<0.000000e+00> : vector<8x768xf32>
    %30 = tpu.matmul %28, %29, %cst_12 {dimension_numbers = #tpu.dot_dimension_numbers<[1], [0], [0], [1], [0, 0, 1, 1], [], []>} : vector<8x256xbf16>, vector<256x768xbf16>, vector<8x768xf32> -> vector<8x768xf32>
    %c0_13 = arith.constant 0 : index
    %c0_14 = arith.constant 0 : index
    %31 = vector.load %arg5[%c0_13, %c0_14] : memref<1x768xf32, #tpu.memory_space<vmem>>, vector<1x768xf32>
    %32 = vector.broadcast %31 : vector<1x768xf32> to vector<8x768xf32>
    %33 = arith.addf %30, %32 : vector<8x768xf32>
    %34 = arith.truncf %33 : vector<8x768xf32> to vector<8x768xbf16>
    %c0_15 = arith.constant 0 : index
    %c0_16 = arith.constant 0 : index
    %c0_17 = arith.constant 0 : index
    %35 = vector.load %arg6[%c0_15, %c0_16, %c0_17] : memref<1x8x768xbf16, #tpu.memory_space<vmem>>, vector<1x8x768xbf16>
    %36 = vector.shape_cast %35 : vector<1x8x768xbf16> to vector<8x768xbf16>
    %37 = vector.shape_cast %34 : vector<8x768xbf16> to vector<1x8x768xbf16>
    tpu.vector_store %arg6[%c0_15, %c0_16, %c0_17], %37 {strides = array<i32>} : memref<1x8x768xbf16, #tpu.memory_space<vmem>>, vector<1x8x768xbf16>,
    return
  }
  func.func @transform_0(%arg0: i32, %arg1: i32) -> (i32, i32, i32) {
    %c0_i32 = arith.constant 0 : i32
    %c0_i32_0 = arith.constant 0 : i32
    return %arg0, %arg1, %c0_i32 : i32, i32, i32
  }
  func.func @transform_1(%arg0: i32, %arg1: i32) -> (i32, i32, i32) {
    %c0_i32 = arith.constant 0 : i32
    %c0_i32_0 = arith.constant 0 : i32
    %c0_i32_1 = arith.constant 0 : i32
    return %arg0, %c0_i32, %c0_i32_0 : i32, i32, i32
  }
  func.func @transform_2(%arg0: i32, %arg1: i32) -> (i32, i32) {
    %c0_i32 = arith.constant 0 : i32
    %c0_i32_0 = arith.constant 0 : i32
    %c0_i32_1 = arith.constant 0 : i32
    return %c0_i32, %c0_i32_0 : i32, i32
  }
  func.func @transform_3(%arg0: i32, %arg1: i32) -> (i32, i32) {
    %c0_i32 = arith.constant 0 : i32
    %c0_i32_0 = arith.constant 0 : i32
    %c0_i32_1 = arith.constant 0 : i32
    return %c0_i32, %c0_i32_0 : i32, i32
  }
  func.func @transform_4(%arg0: i32, %arg1: i32) -> (i32, i32, i32) {
    %c0_i32 = arith.constant 0 : i32
    %c0_i32_0 = arith.constant 0 : i32
    return %arg0, %arg1, %c0_i32 : i32, i32, i32
  }
}

</mosaic_0001>

<bundles_post_ra>
// kernel: tpu_custom_call.1
= control target key start
LH: loop header
LB: loop body
LE: loop exit
PB: predicated region body
PF: predicated region fallthrough
CT: control target
= control target key end

     0   :  { %s1981_s0 = inlined_call_operand.hbm [shape: f32[2,16,256], index: 0, kind: input, shape index: {}]   ;;  %s1982_s1 = inlined_call_operand.vmem [shape: f32[2,6,256], index: 1, kind: input, shape index: {}]   ;;  %s1983_s2 = inlined_call_operand.hbm [shape: bf16[256,768], index: 2, kind: input, shape index: {}]   ;;  %s1984_s3 = inlined_call_operand.vmem [shape: f32[1,768], index: 3, kind: input, shape index: {}]   ;;  %s1985_s4 = inlined_call_operand.hbm [shape: bf16[2,16,768], index: 4, kind: output, shape index: {}]  }
   0x1   :  { %1992 = sst [smem:[#allocation15_spill]] %s1983_s2 }
   0x2   :  { %1993 = sst [smem:[#allocation16_spill]] %s1985_s4 }
   0x3   :  { %9 = vsyncpa [#allocation3], 0 }
   0x4   :  { %11 = vsyncpa [#allocation3 + $0x1], 0 }
   0x5   :  { %12 = vsyncpa [#allocation6], 0 }
   0x6   :  { %13 = vsyncpa [#allocation4], 0 }
   0x7   :  { %15 = vsyncpa [#allocation4 + $0x1], 0  ;;  %s1742_s15 = smov 0   ;;  %s1744_s16 = smov 0  }
   0x8   :  { %s1746_s17 = smov 0   ;;  %s1748_s18 = smov 0  }
   0x9   :  { %s1750_s19 = smov 0   ;;  %s1752_s20 = smov 0  }
   0xa   :  { %s1754_s21 = smov 0   ;;  %s1756_s22 = smov 0  }
   0xb LB: > { %1994 = sst [smem:[#allocation11_spill]] %s1682_s15  ;;  %s1196_s23 = sadd.s32 4294967295, %s1710_s22   ;;  %s1710_s22 = sphi %s1756_s22, %s21_s22   ;;  %s1706_s21 = sphi %s1754_s21, %s2019_s21   ;;  %s1702_s20 = sphi %s1752_s20, %s2014_s20   ;;  %s1698_s19 = sphi %s1750_s19, %s2018_s19   ;;  %s1694_s18 = sphi %s1748_s18, %s2013_s18   ;;  %s1690_s17 = sphi %s1746_s17, %s2017_s17   ;;  %s1686_s16 = sphi %s1744_s16, %s2016_s16   ;;  %s1682_s15 = sphi %s1742_s15, %s2015_s15  }
   0xc   : > { %1995 = sst [smem:[#allocation12_spill]] %s1702_s20  ;;  %s1197_s24 = sadd.s32 4294967294, %s1710_s22  }
   0xd   : > { %p55_p0 = scmp.ne.s32.totalorder %s1686_s16, %s1682_s15  ;;  %p1786_p1 = scmp.eq.s32.totalorder %s1196_s23, 0 }
   0xe   : > { %p1790_p2 = scmp.eq.s32.totalorder %s1196_s23, 3  ;;  %p155_p3 = scmp.eq.s32.totalorder %s1197_s24, 3 }
   0xf   : > { %p1796_p4 = por %p1786_p1, %p55_p0  ;;  %p1198_p5 = scmp.ge.s32.totalorder %s1710_s22, 1 }
  0x10   : > { %p1801_p6 = por %p155_p3, %p55_p0  ;;  %p162_p7 = scmp.lt.s32.totalorder %s1710_s22, 5 }
  0x11   : > { %s1998_s27 = scalar_select %p1796_p4, 1, 0 }
  0x12   : > { %s1999_s28 = scalar_select %p1801_p6, 1, 0 }
  0x13   : > { %p1806_p8 = pnand %p1198_p5, %p162_p7  ;;  %s1712_s30 = smov [#allocation5]  }
  0x14   : > { %2000 = sst [smem:[#allocation13_spill]] %s1999_s28  ;;  %s174_s5 = sshll.u32 %s1712_s30, 4  ;;  %s175_s5 = int_to_ptr.vmem [resolvable:$true] %s174_s5 }
  0x15   : > { %p1327_p9 = pneg %p1806_p8  ;;  %s1567_s6 = scalar_lea.vmem %s175_s5, 12288 }
  0x16   : > { %p1568_p12 = scmp.ne.s32.totalorder %s175_s5, %s1567_s6  ;;  %p1575_p3 = scmp.lt.s32.totalorder %s175_s5, %s175_s5 }
  0x17   : > { %p1328_p10 = pnand %p1327_p9, %p1786_p1  ;;  %p1576_p6 = scmp.lt.s32.totalorder %s1567_s6, %s1567_s6 }
  0x19   : > { %p1558_p11 = pneg %p1328_p10  ;;  %p1577_p4 = por %p1576_p6, %p1575_p3 }
  0x1b   : > { %p1570_p13 = pnand %p1568_p12, %p1558_p11 }
  0x1d   : > { %p1571_p0 = pneg %p1570_p13 }
  0x1f   : > { %p1578_p5 = pnand %p1577_p4, %p1571_p0 }
  0x21   : > { %1581 = shalt.err (!%p1578_p5)
}
  0x22   : > { %s1713_s7 = smov 384   ;;  %s1714_s8 = smov 24  }
  0x23   : > { %s2002_s2 = sld [smem:[#allocation15_spill]]  ;;  %s30_s11 = sadd.s32 1, %s1702_s20 }
  0x24   : > { %p31_p4 = scmp.ge.s32.totalorder %s30_s11, 2  ;;  %s33_s12 = sadd.s32 1, %s1706_s21 }
  0x25   : > { %s42_s13 = sadd.s32 1, %s1690_s17  ;;  %p49_p6 = scmp.ne.s32.totalorder %s1690_s17, %s1686_s16 }
  0x26   : > { %s2021_s11 = smov (%p31_p4, %s30_s11), 0  ;;  %s2023_s12 = smov (!%p31_p4, %s33_s12), %s1706_s21 }
  0x27   : > { %2003 = sst [smem:[#allocation14_spill]] %s2021_s11  ;;  %s38_s14 = ssub.s32 %s1702_s20, %s2021_s11 }
  0x28   : > { %p50_p7 = scmp.eq.s32.totalorder %s1710_s22, 0  ;;  %p35_p9 = scmp.ge.s32.totalorder %s2023_s12, 2 }
  0x29   : > { %1330 = dma.hbm_to_vmem [thread:$0]  (!%p1328_p10), %s2002_s2, 12288, %s175_s5, [#allocation6], %s1713_s7, %s1713_s7, %s1714_s8  }
  0x2a   : > { %p1830_p11 = por %p1790_p2, %p49_p6  ;;  %p1834_p10 = por %p50_p7, %p49_p6 }
  0x2b   : > { %p1340_p12 = scmp.lt.s32.totalorder %s1710_s22, 4  ;;  %s2025_s12 = smov (%p35_p9, %s2023_s12), 0 }
  0x2c   : > { %s191_s30 = sand.u32 1, %s1690_s17   ;;  %s1202_s5 = sshll.u32 %s1702_s20, 1 }
  0x2d   : > { %s37_s6 = ssub.s32 %s1706_s21, %s2025_s12  ;;  %s1201_s8 = sshll.u32 %s191_s30, 4 }
  0x2e   : > { %s39_s7 = sor.u32 %s38_s14, %s37_s6  ;;  %s1203_s26 = sshll.u32 %s1706_s21, 2 }
  0x2f   : > { %p40_p13 = scmp.eq.s32.totalorder %s39_s7, 0  ;;  %s195_s9 = scalar_lea.vmem [#allocation2], %s1201_s8 }
  0x30   : > { %s205_s10 = sshll.u32 %s195_s9, 4  ;;  %s201_s11 = sadd.s32 %s1203_s26, %s1202_s5  ;;  %s206_s10 = int_to_ptr.vmem [resolvable:$true] %s205_s10 }
  0x31   : > { %s1847_s2 = scalar_select %p40_p13, %s1690_s17, %s42_s13  }
  0x32   : > { %s1204_s28 = sshll.u32 %s201_s11, 7  ;;  %p1853_p2 = pnand %p1340_p12, %p1834_p10 }
  0x33   : > { %s203_s14 = scalar_lea.hbm %s1981_s0, %s1204_s28  ;;  %s192_s6 = scalar_lea.sflag [#allocation3], %s191_s30 }
  0x34   : > { %p1584_p0 = pneg %p1853_p2  ;;  %s1595_s7 = scalar_lea.vmem %s206_s10, 256 }
  0x35   : > { %p1596_p3 = scmp.ne.s32.totalorder %s206_s10, %s1595_s7  ;;  %s1715_s13 = smov [#allocation2]  }
  0x36   : > { %s1600_s11 = sshll.u32 %s1715_s13, 4  ;;  %s1601_s11 = int_to_ptr.vmem [resolvable:$false] %s1600_s11 }
  0x37   : > { %p1598_p5 = pnand %p1596_p3, %p1584_p0  ;;  %s1602_s24 = scalar_lea.vmem %s1601_s11, 512 }
  0x38   : > { %p1603_p6 = scmp.lt.s32.totalorder %s206_s10, %s1601_s11  ;;  %p1604_p7 = scmp.lt.s32.totalorder %s1602_s24, %s1595_s7 }
  0x39   : > { %p1599_p4 = pneg %p1598_p5 }
  0x3a   : > { %p1605_p9 = por %p1604_p7, %p1603_p6 }
  0x3c   : > { %p1606_p10 = pnand %p1605_p9, %p1599_p4 }
  0x3e   : > { %1609 = shalt.err (!%p1606_p10)
}
  0x3f   : > { %1334 = dma.hbm_to_vmem [thread:$0]  (!%p1853_p2), %s203_s14, 256, %s206_s10, %s192_s6  }
  0x40   : > { %222 = sbr.rel (%p1806_p8) target bundleno = 662 (0x296), region = 36  ;;  %s1867_s4 = sand.u32 (!%p1806_p8), 1, %s1686_s16  }
  0x41   : > { %s1206_s20 = sshll.u32 (!%p1806_p8), %s1867_s4, 4  ;;  %s225_s28 = scalar_lea.sflag (!%p1806_p8), [#allocation3], %s1867_s4 }
  0x42   : > { %s228_s30 = scalar_lea.vmem (!%p1806_p8), [#allocation2], %s1206_s20  ;;  %p2007_p12 = scmp.ne.s32.totalorder (!%p1806_p8), %s1998_s27, 0 }
  0x45   : > { %1669 = dma.done.wait (%p2007_p12), %s225_s28, 256  }
  0x46   : > { %1671 = vsyncadd (%p2007_p12), %s225_s28, 4294967040 }
  0x47   : > { %1673 = dma.done.wait (%p1786_p1), [#allocation6], 12288  }
  0x48   : > { %1675 = vsyncadd (%p1786_p1), [#allocation6], 4294955008  ;;  %v1879_v0 = vld [vmem:[%s228_s30] sm:$0xff]  ;;  %v1881_v1 = vld [vmem:[%s228_s30 + $0x8] sm:$0xff]  ;;  %p262_p1 = scmp.lt.s32.totalorder %s1698_s19, 1  ;;  %s1316_s9 = smul.u32 24, %s1867_s4 }
  0x49   : > { %v271_v2 = vadd.f32 %v1881_v1, %v1879_v0  ;;  %v1410_v3 = vld [vmem:[#allocation5 + $0x154] ss:$24 sps:$4 sm:$0xff]   ;;  %v1412_v4 = vld [vmem:[#allocation5 + $0x150] ss:$24 sps:$4 sm:$0xff]   ;;  %v1416_v7 = vld [vmem:[#allocation5 + $0x124] ss:$24 sps:$4 sm:$0xff]  }
  0x4a   : > { %v1413_v5 = vld [vmem:[#allocation5 + $0x15c] ss:$24 sps:$4 sm:$0xff]   ;;  %v1415_v6 = vld [vmem:[#allocation5 + $0x158] ss:$24 sps:$4 sm:$0xff]   ;;  %920 = vmatprep.subr.bf16.mxu0 %v1410_v3  ;;  %v1419_v8 = vld [vmem:[#allocation5 + $0x12c] ss:$24 sps:$4 sm:$0xff]  }
  0x4b   : > { %272 = vadd.xlane.f32.xlu0 %v271_v2  ;;  %961 = vmatprep.subr.bf16.mxu1 %v1413_v5  ;;  %v1418_v9 = vld [vmem:[#allocation5 + $0x120] ss:$24 sps:$4 sm:$0xff]   ;;  %v1422_v11 = vld [vmem:[#allocation5 + $0xf4] ss:$24 sps:$4 sm:$0xff]   ;;  %v1424_v13 = vld [vmem:[#allocation5 + $0xf0] ss:$24 sps:$4 sm:$0xff]  }
  0x4c   : > { %921 = vmatpush1.bf16.msra.mxu0 %v1412_v4  ;;  %962 = vmatpush1.bf16.msra.mxu1 %v1415_v6  ;;  %v1421_v10 = vld [vmem:[#allocation5 + $0x128] ss:$24 sps:$4 sm:$0xff]   ;;  %v1425_v12 = vld [vmem:[#allocation5 + $0xfc] ss:$24 sps:$4 sm:$0xff]   ;;  %v1427_v14 = vld [vmem:[#allocation5 + $0xf8] ss:$24 sps:$4 sm:$0xff]  }
  0x4d   : > { %922 = vmatprep.subr.bf16.mxu0 %v1416_v7  ;;  %963 = vmatprep.subr.bf16.mxu1 %v1419_v8  ;;  %v1428_v15 = vld [vmem:[#allocation5 + $0xc4] ss:$24 sps:$4 sm:$0xff]   ;;  %v1430_v17 = vld [vmem:[#allocation5 + $0xc0] ss:$24 sps:$4 sm:$0xff]   ;;  %v1434_v19 = vld [vmem:[#allocation5 + $0x94] ss:$24 sps:$4 sm:$0xff]  }
  0x4e   : > { %v1431_v16 = vld [vmem:[#allocation5 + $0xcc] ss:$24 sps:$4 sm:$0xff]   ;;  %v1433_v18 = vld [vmem:[#allocation5 + $0xc8] ss:$24 sps:$4 sm:$0xff]   ;;  %v1437_v20 = vld [vmem:[#allocation5 + $0x9c] ss:$24 sps:$4 sm:$0xff]  }
  0x4f   : > { %v1436_v21 = vld [vmem:[#allocation5 + $0x90] ss:$24 sps:$4 sm:$0xff]   ;;  %v1440_v23 = vld [vmem:[#allocation5 + $0x64] ss:$24 sps:$4 sm:$0xff]   ;;  %v1442_v25 = vld [vmem:[#allocation5 + $0x60] ss:$24 sps:$4 sm:$0xff]  }
  0x50   : > { %923 = vmatpush1.bf16.msra.mxu0 %v1418_v9  ;;  %964 = vmatpush1.bf16.msra.mxu1 %v1421_v10  ;;  %v1439_v22 = vld [vmem:[#allocation5 + $0x98] ss:$24 sps:$4 sm:$0xff]   ;;  %v1443_v24 = vld [vmem:[#allocation5 + $0x6c] ss:$24 sps:$4 sm:$0xff]   ;;  %v1445_v26 = vld [vmem:[#allocation5 + $0x68] ss:$24 sps:$4 sm:$0xff]  }
  0x51   : > { %924 = vmatprep.subr.bf16.mxu0 %v1422_v11  ;;  %965 = vmatprep.subr.bf16.mxu1 %v1425_v12  ;;  %v1446_v27 = vld [vmem:[#allocation5 + $0x34] ss:$24 sps:$4 sm:$0xff]   ;;  %v1448_v29 = vld [vmem:[#allocation5 + $0x30] ss:$24 sps:$4 sm:$0xff]   ;;  %v1452_v31 = vld [vmem:[#allocation5 + $0x4] ss:$24 sps:$4 sm:$0xff]  }
  0x52   : > { %v1449_v28 = vld [vmem:[#allocation5 + $0x3c] ss:$24 sps:$4 sm:$0xff]   ;;  %v1451_v30 = vld [vmem:[#allocation5 + $0x38] ss:$24 sps:$4 sm:$0xff]   ;;  %v1455_v32 = vld [vmem:[#allocation5 + $0xc] ss:$24 sps:$4 sm:$0xff]  }
  0x53   : > { %v1454_v33 = vld [vmem:[#allocation5] ss:$24 sps:$4 sm:$0xff]   ;;  %v1458_v35 = vld [vmem:[#allocation5 + $0x2d4] ss:$24 sps:$4 sm:$0xff]   ;;  %v1460_v37 = vld [vmem:[#allocation5 + $0x2d0] ss:$24 sps:$4 sm:$0xff]  }
  0x54   : > { %925 = vmatpush1.bf16.msra.mxu0 %v1424_v13  ;;  %966 = vmatpush1.bf16.msra.mxu1 %v1427_v14  ;;  %v1457_v34 = vld [vmem:[#allocation5 + $0x8] ss:$24 sps:$4 sm:$0xff]   ;;  %v1461_v36 = vld [vmem:[#allocation5 + $0x2dc] ss:$24 sps:$4 sm:$0xff]   ;;  %v1463_v38 = vld [vmem:[#allocation5 + $0x2d8] ss:$24 sps:$4 sm:$0xff]   ;;  %v290_v14 = vlaneseq }
  0x55   : > { %926 = vmatprep.subr.bf16.mxu0 %v1428_v15  ;;  %967 = vmatprep.subr.bf16.mxu1 %v1431_v16  ;;  %v1464_v39 = vld [vmem:[#allocation5 + $0x2a4] ss:$24 sps:$4 sm:$0xff]   ;;  %v1466_v41 = vld [vmem:[#allocation5 + $0x2a0] ss:$24 sps:$4 sm:$0xff]   ;;  %v1470_v50 = vld [vmem:[#allocation5 + $0x274] ss:$24 sps:$4 sm:$0xff]  }
  0x56   : > { %v1467_v40 = vld [vmem:[#allocation5 + $0x2ac] ss:$24 sps:$4 sm:$0xff]   ;;  %v1469_v49 = vld [vmem:[#allocation5 + $0x2a8] ss:$24 sps:$4 sm:$0xff]   ;;  %v1473_v52 = vld [vmem:[#allocation5 + $0x27c] ss:$24 sps:$4 sm:$0xff]  }
  0x57   : > { %v1472_v51 = vld [vmem:[#allocation5 + $0x270] ss:$24 sps:$4 sm:$0xff]   ;;  %v1476_v54 = vld [vmem:[#allocation5 + $0x244] ss:$24 sps:$4 sm:$0xff]   ;;  %v1478_v55 = vld [vmem:[#allocation5 + $0x240] ss:$24 sps:$4 sm:$0xff]  }
  0x58   : > { %927 = vmatpush1.bf16.msra.mxu0 %v1430_v17  ;;  %968 = vmatpush1.bf16.msra.mxu1 %v1433_v18  ;;  %v1475_v53 = vld [vmem:[#allocation5 + $0x278] ss:$24 sps:$4 sm:$0xff]   ;;  %v1479_v56 = vld [vmem:[#allocation5 + $0x24c] ss:$24 sps:$4 sm:$0xff]   ;;  %v1481_v57 = vld [vmem:[#allocation5 + $0x248] ss:$24 sps:$4 sm:$0xff]  }
  0x59   : > { %928 = vmatprep.subr.bf16.mxu0 %v1434_v19  ;;  %969 = vmatprep.subr.bf16.mxu1 %v1437_v20  ;;  %v1482_v58 = vld [vmem:[#allocation5 + $0x214] ss:$24 sps:$4 sm:$0xff]   ;;  %v1484_v60 = vld [vmem:[#allocation5 + $0x210] ss:$24 sps:$4 sm:$0xff]   ;;  %v1488_v62 = vld [vmem:[#allocation5 + $0x1e4] ss:$24 sps:$4 sm:$0xff]  }
  0x5a   : > { %v1485_v59 = vld [vmem:[#allocation5 + $0x21c] ss:$24 sps:$4 sm:$0xff]   ;;  %v1487_v61 = vld [vmem:[#allocation5 + $0x218] ss:$24 sps:$4 sm:$0xff]   ;;  %v1491_v63 = vld [vmem:[#allocation5 + $0x1ec] ss:$24 sps:$4 sm:$0xff]  }
  0x5b   : > { %v1494_v2 = vld [vmem:[#allocation5 + $0x1b4] ss:$24 sps:$4 sm:$0xff]   ;;  %v1496_v4 = vld [vmem:[#allocation5 + $0x1b0] ss:$24 sps:$4 sm:$0xff]   ;;  %v1500_v6 = vld [vmem:[#allocation5 + $0x184] ss:$24 sps:$4 sm:$0xff]  }
  0x5c   : > { %929 = vmatpush1.bf16.msra.mxu0 %v1436_v21  ;;  %970 = vmatpush1.bf16.msra.mxu1 %v1439_v22  ;;  %v1497_v3 = vld [vmem:[#allocation5 + $0x1bc] ss:$24 sps:$4 sm:$0xff]   ;;  %v1499_v5 = vld [vmem:[#allocation5 + $0x1b8] ss:$24 sps:$4 sm:$0xff]   ;;  %v1503_v7 = vld [vmem:[#allocation5 + $0x18c] ss:$24 sps:$4 sm:$0xff]  }
  0x5d   : > { %930 = vmatprep.subr.bf16.mxu0 %v1440_v23  ;;  %971 = vmatprep.subr.bf16.mxu1 %v1443_v24  ;;  %v1502_v8 = vld [vmem:[#allocation5 + $0x180] ss:$24 sps:$4 sm:$0xff]   ;;  %v1508_v10 = vld [vmem:[#allocation5 + $0x164] ss:$24 sps:$4 sm:$0xff]   ;;  %s263_s15 = scalar_select %p262_p1, %s1698_s19, 1  ;;  %v1900_v15 = vshrl.u32 %v290_v14, 7 }
  0x5e   : > { %v1505_v9 = vld [vmem:[#allocation5 + $0x188] ss:$24 sps:$4 sm:$0xff]   ;;  %s261_s10 = scalar_lea.vmem [#allocation7], %s1316_s9  ;;  %s1317_s14 = smul.u32 6, %s1694_s18 }
  0x5f   : > { %s1312_s25 = sshll.u32 %s263_s15, 4  ;;  %v1903_v19 = vsub.s32 1, %v1900_v15  ;;  %v1906_v21 = vsub.s32 0, %v1900_v15  ;;  %s1318_s6 = smul.u32 12, %s1698_s19 }
  0x60   : > { %931 = vmatpush1.bf16.msra.mxu0 %v1442_v25  ;;  %972 = vmatpush1.bf16.msra.mxu1 %v1445_v26  ;;  %s266_s5 = scalar_lea.vmem %s1982_s1, %s1312_s25  ;;  %s1087_s11 = sshll.u32 %s261_s10, 4  ;;  %s1088_s11 = int_to_ptr.vmem [resolvable:$true] %s1087_s11 }
  0x61   : > { %932 = vmatprep.subr.bf16.mxu0 %v1446_v27  ;;  %973 = vmatprep.subr.bf16.mxu1 %v1449_v28  ;;  %v270_v16 = vld [vmem:[%s266_s5 + $0x8] sm:$0x3f]  ;;  %v269_v17 = vld [vmem:[%s266_s5] sm:$0x3f]  ;;  %s1083_s7 = sadd.s32 %s1318_s6, %s1317_s14  ;;  %s2008_s20 = sld [smem:[#allocation16_spill]] }
  0x62   : > { %v289_v18 = vadd.f32 1.0, %v270_v16  ;;  %v288_v20 = vadd.f32 1.0, %v269_v17  ;;  %v307_v26 = vrot.slane %v270_v16, %v1906_v21  ;;  %v303_v28 = vrot.slane %v269_v17, %v1906_v21  ;;  %s1309_s13 = sshll.u32 %s1083_s7, 6  ;;  %s1071_s19 = scalar_lea.sflag [#allocation4], %s1867_s4 }
  0x63   : > { %s1610_s15 = scalar_lea.vmem %s1088_s11, 384  ;;  %s1716_s25 = smov [#allocation7]  }
  0x64   : > { %933 = vmatpush1.bf16.msra.mxu0 %v1448_v29  ;;  %974 = vmatpush1.bf16.msra.mxu1 %v1451_v30  ;;  %v297_v22 = vrot.slane %v289_v18, %v1903_v19  ;;  %v293_v23 = vrot.slane %v288_v20, %v1903_v19  ;;  %p1611_p8 = scmp.ne.s32.totalorder %s1088_s11, %s1610_s15  ;;  %s1614_s27 = sshll.u32 %s1716_s25, 4  ;;  %s1615_s27 = int_to_ptr.vmem [resolvable:$false] %s1614_s27 }
  0x65   : > { %934 = vmatprep.subr.bf16.mxu0 %v1452_v31  ;;  %975 = vmatprep.subr.bf16.mxu1 %v1455_v32  ;;  %s1616_s29 = scalar_lea.vmem %s1615_s27, 768  ;;  %p1617_p0 = scmp.lt.s32.totalorder %s1088_s11, %s1615_s27 }
  0x66   : > { %p1612_p13 = pnand %p1611_p8, %p1830_p11  ;;  %p1618_p3 = scmp.lt.s32.totalorder %s1616_s29, %s1610_s15 }
  0x67   : > { %s2009_s28 = smov %s2008_s20  ;;  %s1934_s30 = scalar_lea.hbm %s2008_s20, %s1309_s13 }
  0x68   : > { %935 = vmatpush1.bf16.msra.mxu0 %v1454_v33  ;;  %976 = vmatpush1.bf16.msra.mxu1 %v1457_v34  ;;  %v1506_v34 = vld [vmem:[#allocation5 + $0x160] ss:$24 sps:$4 sm:$0xff]   ;;  %p1613_p2 = pneg %p1612_p13  ;;  %p1619_p5 = por %p1618_p3, %p1617_p0 }
  0x69   : > { %936 = vmatprep.subr.bf16.mxu0 %v1458_v35  ;;  %977 = vmatprep.subr.bf16.mxu1 %v1461_v36  ;;  %v1511_v36 = vld [vmem:[#allocation5 + $0x134] ss:$24 sps:$4 sm:$0xff]  }
  0x6a   : > { %p1620_p4 = pnand %p1619_p5, %p1613_p2 }
  0x6c   : > { %937 = vmatpush2.bf16.msra.mxu0 %v1460_v37  ;;  %978 = vmatpush2.bf16.msra.mxu1 %v1463_v38  ;;  %v1509_v37 = vld [vmem:[#allocation5 + $0x130] ss:$24 sps:$4 sm:$0xff]   ;;  %v1514_v38 = vld [vmem:[#allocation5 + $0x104] ss:$24 sps:$4 sm:$0xff]  }
  0x6d   : > { %938 = vmatprep.subr.bf16.mxu0 %v1464_v39  ;;  %979 = vmatprep.subr.bf16.mxu1 %v1467_v40  ;;  %v1512_v39 = vld [vmem:[#allocation5 + $0x100] ss:$24 sps:$4 sm:$0xff]   ;;  %v1517_v40 = vld [vmem:[#allocation5 + $0xd4] ss:$24 sps:$4 sm:$0xff]  }
  0x70   : > { %939 = vmatpush2.bf16.msra.mxu0 %v1466_v41  ;;  %980 = vmatpush2.bf16.msra.mxu1 %v1469_v49  ;;  %v1515_v41 = vld [vmem:[#allocation5 + $0xd0] ss:$24 sps:$4 sm:$0xff]  }
  0x71   : > { %940 = vmatprep.subr.bf16.mxu0 %v1470_v50  ;;  %981 = vmatprep.subr.bf16.mxu1 %v1473_v52  ;;  %v1527_v49 = vld [vmem:[#allocation5 + $0x10] ss:$24 sps:$4 sm:$0xff]   ;;  %v1532_v50 = vld [vmem:[#allocation5 + $0x2e4] ss:$24 sps:$4 sm:$0xff]   ;;  %v1535_v52 = vld [vmem:[#allocation5 + $0x2b4] ss:$24 sps:$4 sm:$0xff]  }
  0x74   : > { %941 = vmatpush2.bf16.msra.mxu0 %v1472_v51  ;;  %982 = vmatpush2.bf16.msra.mxu1 %v1475_v53  ;;  %v1530_v51 = vld [vmem:[#allocation5 + $0x2e0] ss:$24 sps:$4 sm:$0xff]   ;;  %v1533_v53 = vld [vmem:[#allocation5 + $0x2b0] ss:$24 sps:$4 sm:$0xff]  }
  0x75   : > { %942 = vmatprep.subr.bf16.mxu0 %v1476_v54  ;;  %983 = vmatprep.subr.bf16.mxu1 %v1479_v56  ;;  %v1538_v54 = vld [vmem:[#allocation5 + $0x284] ss:$24 sps:$4 sm:$0xff]   ;;  %v1541_v56 = vld [vmem:[#allocation5 + $0x254] ss:$24 sps:$4 sm:$0xff]  }
  0x78   : > { %943 = vmatpush2.bf16.msra.mxu0 %v1478_v55  ;;  %984 = vmatpush2.bf16.msra.mxu1 %v1481_v57  ;;  %v1536_v55 = vld [vmem:[#allocation5 + $0x280] ss:$24 sps:$4 sm:$0xff]   ;;  %v1539_v57 = vld [vmem:[#allocation5 + $0x250] ss:$24 sps:$4 sm:$0xff]  }
  0x79   : > { %944 = vmatprep.subr.bf16.mxu0 %v1482_v58  ;;  %985 = vmatprep.subr.bf16.mxu1 %v1485_v59  ;;  %v1544_v58 = vld [vmem:[#allocation5 + $0x224] ss:$24 sps:$4 sm:$0xff]   ;;  %v1542_v59 = vld [vmem:[#allocation5 + $0x220] ss:$24 sps:$4 sm:$0xff]  }
  0x7c   : > { %945 = vmatpush2.bf16.msra.mxu0 %v1484_v60  ;;  %986 = vmatpush2.bf16.msra.mxu1 %v1487_v61  ;;  %v1547_v60 = vld [vmem:[#allocation5 + $0x1f4] ss:$24 sps:$4 sm:$0xff]   ;;  %v1545_v61 = vld [vmem:[#allocation5 + $0x1f0] ss:$24 sps:$4 sm:$0xff]  }
  0x7d   : > { %946 = vmatprep.subr.bf16.mxu0 %v1488_v62  ;;  %987 = vmatprep.subr.bf16.mxu1 %v1491_v63  ;;  %v1550_v62 = vld [vmem:[#allocation5 + $0x1c4] ss:$24 sps:$4 sm:$0xff]   ;;  %v1548_v63 = vld [vmem:[#allocation5 + $0x1c0] ss:$24 sps:$4 sm:$0xff]  }
  0xd4   : > { %v273_v42 = vpop.xlane.xlu0 %272 }
  0xd5   : > { %v275_v43 = vmul.f32 0.00390625, %v273_v42  ;;  %v1520_v42 = vld [vmem:[#allocation5 + $0xa4] ss:$24 sps:$4 sm:$0xff]  }
  0xd7   : > { %v1886_v44 = vsub.f32 %v1879_v0, %v275_v43  ;;  %v1889_v45 = vsub.f32 %v1881_v1, %v275_v43  ;;  %v1490_v0 = vld [vmem:[#allocation5 + $0x1e0] ss:$24 sps:$4 sm:$0xff]  }
  0xd8   : > { %v1493_v1 = vld [vmem:[#allocation5 + $0x1e8] ss:$24 sps:$4 sm:$0xff]   ;;  %947 = vmatpush2.bf16.msra.mxu0 %v1490_v0  ;;  %v1553_v0 = vld [vmem:[#allocation5 + $0x194] ss:$24 sps:$4 sm:$0xff]  }
  0xd9   : > { %v278_v46 = vmul.f32 %v1886_v44, %v1886_v44  ;;  %v279_v47 = vmul.f32 %v1889_v45, %v1889_v45  ;;  %988 = vmatpush2.bf16.msra.mxu1 %v1493_v1  ;;  %948 = vmatprep.subr.bf16.mxu0 %v1494_v2  ;;  %v1518_v43 = vld [vmem:[#allocation5 + $0xa0] ss:$24 sps:$4 sm:$0xff]   ;;  %v1551_v1 = vld [vmem:[#allocation5 + $0x190] ss:$24 sps:$4 sm:$0xff]   ;;  %v420_v2 = vsub.s32 2, %v1900_v15 }
  0xda   : > { %989 = vmatprep.subr.bf16.mxu1 %v1497_v3  ;;  %v424_v3 = vsub.s32 3, %v1900_v15 }
  0xdb   : > { %v280_v48 = vadd.f32 %v279_v47, %v278_v46  ;;  %v1526_v46 = vld [vmem:[#allocation5 + $0x44] ss:$24 sps:$4 sm:$0xff]   ;;  %v1524_v47 = vld [vmem:[#allocation5 + $0x40] ss:$24 sps:$4 sm:$0xff]  }
  0xdc   : > { %949 = vmatpush2.bf16.msra.mxu0 %v1496_v4  ;;  %v408_v4 = vld [vmem:[%s1984_s3] sm:$0x3f] }
  0xdd   : > { %281 = vadd.xlane.f32.xlu0 %v280_v48  ;;  %990 = vmatpush2.bf16.msra.mxu1 %v1499_v5  ;;  %v1529_v48 = vld [vmem:[#allocation5 + $0x14] ss:$24 sps:$4 sm:$0xff]   ;;  %v413_v5 = vrot.slane %v408_v4, %v1906_v21 }
  0xde   : > { %950 = vmatprep.subr.bf16.mxu0 %v1500_v6  ;;  %991 = vmatprep.subr.bf16.mxu1 %v1503_v7  ;;  %v421_v6 = vrot.slane %v408_v4, %v420_v2  ;;  %v417_v7 = vrot.slane %v408_v4, %v1903_v19  ;;  %v428_v19 = vsub.s32 4, %v1900_v15 }
  0xe0   : > { %951 = vmatpush2.bf16.msra.mxu0 %v1502_v8  ;;  %v425_v8 = vrot.slane %v408_v4, %v424_v3 }
  0xe1   : > { %992 = vmatpush2.bf16.msra.mxu1 %v1505_v9  ;;  %1002 = vmatprep.subr.bf16.mxu0 %v1508_v10 }
 0x166   : > { %v282_v11 = vpop.xlane.xlu0 %281 }
 0x167   : > { %v283_v12 = vmul.f32 0.00390625, %v282_v11 }
 0x169   : > { %v284_v13 = vadd.f32 1e-06, %v283_v12 }
 0x16b   : > { %1554 = vrsqrt.f32 %v284_v13 }
 0x178   : > { %v1555_v24 = vpop.eup %1554 }
 0x179   : > { %v287_v25 = vmul.f32 %v1555_v24, %v1889_v45  ;;  %v286_v27 = vmul.f32 %v1555_v24, %v1886_v44  ;;  %v1523_v44 = vld [vmem:[#allocation5 + $0x74] ss:$24 sps:$4 sm:$0xff]   ;;  %v1521_v45 = vld [vmem:[#allocation5 + $0x70] ss:$24 sps:$4 sm:$0xff]  }
 0x17b   : > { %v299_v29 = vmul.f32 %v297_v22, %v287_v25  ;;  %v298_v30 = vmul.f32 %v293_v23, %v286_v27  ;;  %v432_v25 = vsub.s32 5, %v1900_v15 }
 0x17d   : > { %v309_v31 = vadd.f32 %v307_v26, %v299_v29  ;;  %v308_v32 = vadd.f32 %v303_v28, %v298_v30  ;;  %v429_v26 = vrot.slane %v408_v4, %v428_v19  ;;  %v433_v27 = vrot.slane %v408_v4, %v432_v25 }
 0x17f   : > { %v311_v33 = vpack.c.bf16 %v309_v31, %v309_v31  ;;  %v1914_v35 = vpack.c.bf16 %v308_v32, %v308_v32 }
 0x181   : > { %952 = vmatprep.mubr.bf16.mxu0 %v311_v33  ;;  %993 = vmatprep.mubr.bf16.mxu1 %v311_v33 }
 0x182   : > { %953 = vmatmul.mubr.bf16.vlgmr.msra.gmra.mxu0 %v1914_v35  ;;  %994 = vmatmul.mubr.bf16.vlgmr.msra.gmra.mxu1 %v1914_v35 }
 0x183   : > { %1003 = vmatpush1.bf16.msra.mxu0 %v1506_v34  ;;  %1034 = vmatprep.mubr.bf16.mxu0 %v311_v33 }
 0x184   : > { %1004 = vmatprep.subr.bf16.mxu0 %v1511_v36 }
 0x187   : > { %1005 = vmatpush1.bf16.msra.mxu0 %v1509_v37 }
 0x188   : > { %1006 = vmatprep.subr.bf16.mxu0 %v1514_v38 }
 0x18b   : > { %1007 = vmatpush1.bf16.msra.mxu0 %v1512_v39 }
 0x18c   : > { %1008 = vmatprep.subr.bf16.mxu0 %v1517_v40 }
 0x18f   : > { %1009 = vmatpush1.bf16.msra.mxu0 %v1515_v41 }
 0x190   : > { %1010 = vmatprep.subr.bf16.mxu0 %v1520_v42 }
 0x193   : > { %1011 = vmatpush1.bf16.msra.mxu0 %v1518_v43 }
 0x194   : > { %1012 = vmatprep.subr.bf16.mxu0 %v1523_v44 }
 0x197   : > { %1013 = vmatpush1.bf16.msra.mxu0 %v1521_v45 }
 0x198   : > { %1014 = vmatprep.subr.bf16.mxu0 %v1526_v46 }
 0x19b   : > { %1015 = vmatpush1.bf16.msra.mxu0 %v1524_v47 }
 0x19c   : > { %1016 = vmatprep.subr.bf16.mxu0 %v1529_v48 }
 0x19f   : > { %1017 = vmatpush1.bf16.msra.mxu0 %v1527_v49 }
 0x1a0   : > { %1018 = vmatprep.subr.bf16.mxu0 %v1532_v50 }
 0x1a3   : > { %1019 = vmatpush2.bf16.msra.mxu0 %v1530_v51 }
 0x1a4   : > { %1020 = vmatprep.subr.bf16.mxu0 %v1535_v52 }
 0x1a7   : > { %1021 = vmatpush2.bf16.msra.mxu0 %v1533_v53 }
 0x1a8   : > { %1022 = vmatprep.subr.bf16.mxu0 %v1538_v54 }
 0x1ab   : > { %1023 = vmatpush2.bf16.msra.mxu0 %v1536_v55 }
 0x1ac   : > { %1024 = vmatprep.subr.bf16.mxu0 %v1541_v56 }
 0x1af   : > { %1025 = vmatpush2.bf16.msra.mxu0 %v1539_v57 }
 0x1b0   : > { %1026 = vmatprep.subr.bf16.mxu0 %v1544_v58 }
 0x1b3   : > { %1027 = vmatpush2.bf16.msra.mxu0 %v1542_v59 }
 0x1b4   : > { %1028 = vmatprep.subr.bf16.mxu0 %v1547_v60 }
 0x1b7   : > { %1029 = vmatpush2.bf16.msra.mxu0 %v1545_v61 }
 0x1b8   : > { %1030 = vmatprep.subr.bf16.mxu0 %v1550_v62 }
 0x1bb   : > { %1031 = vmatpush2.bf16.msra.mxu0 %v1548_v63 }
 0x1bc   : > { %1032 = vmatprep.subr.bf16.mxu0 %v1553_v0 }
 0x1bf   : > { %1033 = vmatpush2.bf16.msra.mxu0 %v1551_v1 }
 0x1c2   : > { %1035 = vmatmul.mubr.bf16.vlgmr.msra.gmra.mxu0 %v1914_v35 }
 0x242   : > { %v954_v9 = vpop.f32.mrf.mxu0  ;;  %v995_v10 = vpop.f32.mrf.mxu1 }
 0x243   : > { %v955_v13 = vadd.f32 %v954_v9, %v413_v5  ;;  %v996_v14 = vadd.f32 %v995_v10, %v421_v6 }
 0x244   : > { %v956_v11 = vpop.f32.mrf.mxu0  ;;  %v997_v12 = vpop.f32.mrf.mxu1 }
 0x245   : > { %v957_v16 = vadd.f32 %v956_v11, %v417_v7  ;;  %v998_v17 = vadd.f32 %v997_v12, %v425_v8 }
 0x246   : > { %v958_v18 = vpop.f32.mrf.mxu0  ;;  %v999_v20 = vpop.f32.mrf.mxu1 }
 0x247   : > { %v1313_v22 = vpack.c.bf16 %v957_v16, %v955_v13  ;;  %v1314_v23 = vpack.c.bf16 %v998_v17, %v996_v14 }
 0x248   : > { %v959_v21 = vpop.f32.mrf.mxu0  ;;  %v1000_v24 = vpop.f32.mrf.mxu1 }
 0x249   : > { %1067 = vst [vmem:[%s261_s10] sm:$0xff] %v1313_v22  ;;  %1068 = vst [vmem:[%s261_s10 + $0x8] sm:$0xff] %v1314_v23 }
 0x282   : > { %v1036_v28 = vpop.f32.mrf.mxu0 }
 0x283   : > { %v1037_v30 = vadd.f32 %v1036_v28, %v429_v26 }
 0x284   : > { %v1038_v29 = vpop.f32.mrf.mxu0 }
 0x285   : > { %v1039_v31 = vadd.f32 %v1038_v29, %v433_v27 }
 0x286   : > { %v1040_v32 = vpop.f32.mrf.mxu0 }
 0x287   : > { %v1315_v33 = vpack.c.bf16 %v1039_v31, %v1037_v30 }
 0x288   : > { %v1041_v15 = vpop.f32.mrf.mxu0 }
 0x289   : > { %1069 = vst [vmem:[%s261_s10 + $0x10] sm:$0xff] %v1315_v33 }
 0x28a   : > { %1623 = shalt.err (!%p1620_p4)
}
 0x28b   : > { %s1624_s5 = scalar_lea.hbm %s1934_s30, 384  ;;  %s1628_s26 = scalar_lea.hbm %s2009_s28, 1536 }
 0x28c   : > { %p1625_p6 = scmp.ne.s32.totalorder %s1934_s30, %s1624_s5  ;;  %p1629_p10 = scmp.lt.s32.totalorder %s1934_s30, %s2009_s28 }
 0x28d   : > { %p1630_p12 = scmp.lt.s32.totalorder %s1628_s26, %s1624_s5 }
 0x28e   : > { %p1626_p7 = pnand %p1625_p6, %p1830_p11 }
 0x28f   : > { %p1631_p1 = por %p1630_p12, %p1629_p10 }
 0x290   : > { %p1627_p9 = pneg %p1626_p7 }
 0x292   : > { %p1632_p8 = pnand %p1631_p1, %p1627_p9 }
 0x294   : > { %1635 = shalt.err (!%p1632_p8)
}
 0x295   : > { %1325 = dma.vmem_to_hbm [thread:$0]  (%p1830_p11), %s1088_s11, 384, %s1934_s30, %s1071_s19  }
 0x296 PF: > { %s2010_s14 = sld [smem:[#allocation11_spill]]  ;;  %p1342_p13 = scmp.ge.s32.totalorder %s1710_s22, 2 }
 0x297   : > { %s2011_s6 = sld [smem:[#allocation13_spill]] }
 0x29c   : > { %s1099_s7 = sand.u32 1, %s2010_s14  }
 0x29d   : > { %p2012_p2 = scmp.ne.s32.totalorder %s2011_s6, 0  ;;  %s1100_s13 = scalar_lea.sflag [#allocation4], %s1099_s7 }
 0x29f   : > { %p1336_p0 = pnand %p1342_p13, %p2012_p2 }
 0x2a1   : > { %p1337_p3 = pneg %p1336_p0 }
 0x2a3   : > { %1677 = dma.done.wait (%p1337_p3), %s1100_s13, 384  }
 0x2a4   : > { %1679 = vsyncadd (%p1337_p3), %s1100_s13, 4294966912  ;;  %s21_s22 = sadd.s32 1, %s1710_s22   ;;  %s2013_s18 = sld [smem:[#allocation12_spill]] }
 0x2a5   : > { %p18_p5 = scmp.ge.s32.totalorder %s21_s22, 6   ;;  %s2014_s20 = sld [smem:[#allocation14_spill]] }
 0x2a6   : > { %s2015_s15 = smov %s1686_s16  ;;  %s2016_s16 = smov %s1690_s17 }
 0x2a7   : > { %s2017_s17 = smov %s1847_s2  ;;  %s2018_s19 = smov %s1706_s21 }
 0x2a8   : > { %s2019_s21 = smov %s2025_s12  ;;  %20 = sbr.rel (!%p18_p5) target bundleno = 11 (0xb), region = 88 }
 0x2ad   :  { %1105 = vsyncpa [#allocation3], 1 }
 0x2ae   :  { %1107 = vsyncpa [#allocation3 + $0x1], 1 }
 0x2af   :  { %1108 = vsyncpa [#allocation6], 1 }
 0x2b0   :  { %1109 = vsyncpa [#allocation4], 1 }
 0x2b1   :  { %1111 = vsyncpa [#allocation4 + $0x1], 1 }

</bundles_post_ra>
